<compile_context>
chip_gen: v7x
topology: tpu7x:2x2x1
jax: 0.10.0
libtpu: 0.0.40
codegen_flags: <defaults>
</compile_context>

<pallas_src>
import jax
import jax.numpy as jnp
from jax.experimental import pallas as pl
from jax.experimental.pallas import tpu as pltpu

_LANES = 128
_SUBLANE_MULT = 32                      # tile rows multiple of 32: safe for f32/bf16/int8 packing
_MIN_PIPELINE_BYTES = 2 * 1024 * 1024   # below this a single full-extent block is fine


def _mult_kernel(a_ref, x_ref, o_ref):
    # a_ref: (1,) float32 scalar prefetched into SMEM.
    # x_ref / o_ref: lane-dense [tile_rows, 128] VMEM tiles. Pure VPU multiply;
    # the kernel is HBM-bandwidth bound, compute is negligible.
    o_ref[...] = (x_ref[...] * a_ref[0]).astype(o_ref.dtype)


def _cdiv(a, b):
    return -(-a // b)


def _round_up(v, m):
    return ((v + m - 1) // m) * m


def _pick_tiling(rows: int, itemsize: int):
    """Generation-aware (tile_rows, grid_steps, vmem_limit) for a [rows, 128] slab."""
    vmem_cap = None
    try:
        vmem_cap = getattr(pltpu.get_tpu_info(), "vmem_capacity_bytes", None)
    except Exception:
        vmem_cap = None
    if not vmem_cap:
        vmem_cap = 64 * 1024 * 1024     # conservative fallback: v7x per-TC VMEM

    if vmem_cap >= 96 * 1024 * 1024:
        # v5e / v6e: 128 MiB VMEM -> big blocks, generous scoped limit.
        target_block_bytes = 16 * 1024 * 1024
        vmem_limit_cap = 96 * 1024 * 1024
    else:
        # v7x (64 MiB/TC) or unknown: 2x(in+out) ~10 MiB buffers + slack < 48 MiB.
        target_block_bytes = 10 * 1024 * 1024
        vmem_limit_cap = 48 * 1024 * 1024

    row_bytes = _LANES * itemsize
    total_bytes = rows * row_bytes
    max_tile_rows = max(
        _SUBLANE_MULT,
        (target_block_bytes // row_bytes) // _SUBLANE_MULT * _SUBLANE_MULT)

    if total_bytes <= _MIN_PIPELINE_BYTES:
        # Tiny tensor: one full-extent block (full-dim blocks are exempt from
        # the (8,128) divisibility rule); latency-dominated anyway.
        tile_rows = rows
        grid_steps = 1
    else:
        # Force >=4 grid steps so read / compute / writeback overlap, and keep
        # the step count even so v7x's two TensorCores split the "parallel"
        # grid axis evenly. The last block may be partial (masked writes).
        steps = max(4, _cdiv(rows, max_tile_rows))
        if steps % 2:
            steps += 1
        tile_rows = min(max_tile_rows, _round_up(_cdiv(rows, steps), _SUBLANE_MULT))
        grid_steps = _cdiv(rows, tile_rows)

    block_bytes = tile_rows * row_bytes
    # Double-buffered input + output blocks, plus slack. Raise above the
    # 16/32 MiB default scoped limits, stay under the per-generation cap.
    vmem_limit = max(32 * 1024 * 1024,
                     min(vmem_limit_cap, 4 * block_bytes + (2 << 20)))
    return tile_rows, grid_steps, vmem_limit


def _mult_2d(x2d: jax.Array, a_arr: jax.Array) -> jax.Array:
    rows = x2d.shape[0]
    itemsize = jnp.dtype(x2d.dtype).itemsize
    tile_rows, grid_steps, vmem_limit = _pick_tiling(rows, itemsize)

    return pl.pallas_call(
        _mult_kernel,
        out_shape=jax.ShapeDtypeStruct((rows, _LANES), x2d.dtype),
        grid_spec=pltpu.PrefetchScalarGridSpec(
            num_scalar_prefetch=1,          # `a` -> SMEM, readable inside kernel
            grid=(grid_steps,),
            in_specs=[pl.BlockSpec((tile_rows, _LANES), lambda i, a: (i, 0))],
            out_specs=pl.BlockSpec((tile_rows, _LANES), lambda i, a: (i, 0)),
        ),
        compiler_params=pltpu.CompilerParams(
            dimension_semantics=("parallel",),   # v7x: shard steps across both TCs
            vmem_limit_bytes=vmem_limit,
        ),
        # input_output_aliases={1: 0} would let y reuse x's HBM buffer; left off
        # because callers (and the checks below) still read x after the call.
    )(a_arr, x2d)


def mult_model(x: jax.Array, a) -> jax.Array:
    """MultModel.forward: y = a * x (elementwise)."""
    orig_shape = x.shape
    dtype = x.dtype
    n = x.size

    # `a` rides in SMEM as a (1,) f32 scalar; works for Python floats and for
    # traced jax scalars under jit/grad without re-lowering the Mosaic kernel.
    a_arr = jnp.asarray(a, dtype=jnp.float32).reshape((1,))

    if n == 0:
        return x

    x_flat = x.reshape(-1)
    n_main = (n // _LANES) * _LANES

    if n_main == 0:
        # Fewer than 128 elements: plain XLA is optimal.
        return (a_arr[0] * x_flat).astype(dtype).reshape(orig_shape)

    if n_main == n:
        # Common case (e.g. NCHW activations): lane-aligned, no pad/slice at all.
        x2d = x_flat.reshape(n // _LANES, _LANES)
        return _mult_2d(x2d, a_arr).reshape(orig_shape)

    # Ragged tail (< 128 elements): Pallas on the 128-aligned prefix, plain XLA
    # on the tail. Avoids padding + slicing the whole tensor through HBM.
    x2d = x_flat[:n_main].reshape(n_main // _LANES, _LANES)
    out_main = _mult_2d(x2d, a_arr).reshape(-1)
    tail = (a_arr[0] * x_flat[n_main:]).astype(dtype)
    return jnp.concatenate([out_main, tail]).reshape(orig_shape)


if __name__ == "__main__":
    key = jax.random.PRNGKey(0)
    a_val = 2.0  # MultModel(val)

    # Primary small NCHW input consistent with the module's elementwise forward.
    x = jax.random.normal(key, (2, 4, 16, 16), dtype=jnp.float32)
    y = jax.block_until_ready(mult_model(x, a_val))
    assert y.shape == x.shape and y.dtype == x.dtype
    assert jnp.allclose(y, a_val * x, atol=1e-6, rtol=1e-6)

    # Same call under jit with `a` as a traced argument (SMEM path, no re-bake).
    y_jit = jax.block_until_ready(jax.jit(mult_model)(x, a_val))
    assert jnp.allclose(y_jit, a_val * x, atol=1e-6, rtol=1e-6)

    # Ragged size (n % 128 != 0): exercises the aligned-prefix + XLA-tail path.
    x_rag = jax.random.normal(jax.random.PRNGKey(1), (3, 5, 41), dtype=jnp.float32)
    y_rag = jax.block_until_ready(mult_model(x_rag, a_val))
    assert jnp.allclose(y_rag, a_val * x_rag, atol=1e-6, rtol=1e-6)

    # Medium tensor: exercises the pipelined multi-step (even, >=4) grid path.
    x_med = jax.random.normal(jax.random.PRNGKey(2), (8, 64, 64, 64), dtype=jnp.float32)
    y_med = jax.block_until_ready(mult_model(x_med, a_val))
    assert jnp.allclose(y_med, a_val * x_med, atol=1e-6, rtol=1e-6)

    print("KERNEL_OK")
</pallas_src>

<mosaic_0001>
module attributes {stable_mosaic.version = 11 : i64} {
  func.func @_mult_kernel(%arg0: i32, %arg1: memref<1xf32, #tpu.memory_space<smem>>, %arg2: memref<16x128xf32, #tpu.memory_space<vmem>>, %arg3: memref<16x128xf32, #tpu.memory_space<vmem>>) attributes {dimension_semantics = [#tpu.dimension_semantics<parallel>], iteration_bounds = array<i64: 1>, scalar_prefetch = 1 : i64, scratch_operands = 0 : i64, tpu.core_type = #tpu.core_type<tc>, window_params = [{transform_indices = @transform_0, window_bounds = array<i64: 16, 128>}, {transform_indices = @transform_1, window_bounds = array<i64: 16, 128>}]} {
    %c0 = arith.constant 0 : index
    %c0_0 = arith.constant 0 : index
    %0 = vector.load %arg2[%c0, %c0_0] : memref<16x128xf32, #tpu.memory_space<vmem>>, vector<16x128xf32>
    %c0_1 = arith.constant 0 : index
    %1 = memref.load %arg1[%c0_1] : memref<1xf32, #tpu.memory_space<smem>>
    %2 = vector.broadcast %1 : f32 to vector<16x128xf32>
    %3 = arith.mulf %0, %2 : vector<16x128xf32>
    %c0_2 = arith.constant 0 : index
    %c0_3 = arith.constant 0 : index
    %4 = vector.load %arg3[%c0_2, %c0_3] : memref<16x128xf32, #tpu.memory_space<vmem>>, vector<16x128xf32>
    tpu.vector_store %arg3[%c0_2, %c0_3], %3 {strides = array<i32>} : memref<16x128xf32, #tpu.memory_space<vmem>>, vector<16x128xf32>,
    return
  }
  func.func @transform_0(%arg0: i32, %arg1: memref<1xf32, #tpu.memory_space<smem>>) -> (i32, i32) {
    %c0_i32 = arith.constant 0 : i32
    %c0_i32_0 = arith.constant 0 : i32
    return %arg0, %c0_i32 : i32, i32
  }
  func.func @transform_1(%arg0: i32, %arg1: memref<1xf32, #tpu.memory_space<smem>>) -> (i32, i32) {
    %c0_i32 = arith.constant 0 : i32
    %c0_i32_0 = arith.constant 0 : i32
    return %arg0, %c0_i32 : i32, i32
  }
}

</mosaic_0001>

<bundles_post_ra>
// kernel: tpu_custom_call.1
= control target key start
LH: loop header
LB: loop body
LE: loop exit
PB: predicated region body
PF: predicated region fallthrough
CT: control target
= control target key end

     0   :  { %8 = vsyncpa [#allocation5], 0  ;;  %s154_s0 = inlined_call_operand.<no memory space> [shape: f32[1], index: 0, kind: input, shape index: {}]   ;;  %s155_s1 = inlined_call_operand.hbm [shape: f32[16,128], index: 1, kind: input, shape index: {}]   ;;  %s156_s2 = inlined_call_operand.hbm [shape: f32[16,128], index: 2, kind: output, shape index: {}]  }
   0x1   :  { %9 = vsyncpa [#allocation6], 0  ;;  %s102_s9 = smov [#allocation4]   ;;  %s54_s13 = scalar_lea.hbm %s155_s1, 256 }
   0x2   :  { %s15_s10 = sshll.u32 %s102_s9, 4  ;;  %p55_p0 = scmp.ne.s32.totalorder %s155_s1, %s54_s13  ;;  %s16_s10 = int_to_ptr.vmem [resolvable:$true] %s15_s10 }
   0x3   :  { %p58_p1 = scmp.lt.u32.totalorder %s54_s13, %s155_s1 }
   0x5   :  { %p60_p2 = pnand %p58_p1, %p55_p0 }
   0x7   :  { %63 = shalt.err (!%p60_p2)
}
   0x8   :  { %s64_s18 = scalar_lea.vmem %s16_s10, 256  ;;  %p69_p4 = scmp.lt.s32.totalorder %s16_s10, %s16_s10 }
   0x9   :  { %p65_p3 = scmp.ne.s32.totalorder %s16_s10, %s64_s18  ;;  %p70_p5 = scmp.lt.s32.totalorder %s64_s18, %s64_s18 }
   0xb   :  { %p71_p6 = por %p70_p5, %p69_p4 }
   0xd   :  { %p72_p7 = pnand %p71_p6, %p65_p3 }
   0xf   :  { %75 = shalt.err (!%p72_p7)
}
  0x10   :  { %s103_s19 = smov 128   ;;  %s104_s20 = smov 8  }
  0x11   :  { %21 = dma.hbm_to_vmem [thread:$0]  %s155_s1, 256, %s16_s10, [#allocation5], %s103_s19, %s103_s19, %s104_s20  }
  0x12   :  { %98 = dma.done.wait [#allocation5], 256  }
  0x13   :  { %99 = vsyncadd [#allocation5], 4294967040  ;;  %v28_v0 = vstv %s154_s0  ;;  %s105_s25 = smov [#allocation7]   ;;  %v25_v1 = vld [vmem:[#allocation4] sm:$0xff]  ;;  %v26_v2 = vld [vmem:[#allocation4 + $0x8] sm:$0xff] }
  0x14   :  { %s38_s26 = sshll.u32 %s105_s25, 4  ;;  %v29_v3 = vmul.f32 %v28_v0, %v25_v1  ;;  %v30_v4 = vmul.f32 %v28_v0, %v26_v2  ;;  %s39_s26 = int_to_ptr.vmem [resolvable:$true] %s38_s26 }
  0x15   :  { %s76_s27 = scalar_lea.vmem %s39_s26, 256  ;;  %p81_p9 = scmp.lt.s32.totalorder %s39_s26, %s39_s26 }
  0x16   :  { %31 = vst [vmem:[#allocation7] sm:$0xff] %v29_v3  ;;  %32 = vst [vmem:[#allocation7 + $0x8] sm:$0xff] %v30_v4  ;;  %p77_p8 = scmp.ne.s32.totalorder %s39_s26, %s76_s27  ;;  %p82_p10 = scmp.lt.s32.totalorder %s76_s27, %s76_s27 }
  0x18   :  { %p83_p11 = por %p82_p10, %p81_p9 }
  0x1a   :  { %p84_p12 = pnand %p83_p11, %p77_p8 }
  0x1c   :  { %87 = shalt.err (!%p84_p12)
}
  0x1d   :  { %s88_s0 = scalar_lea.hbm %s156_s2, 256 }
  0x1e   :  { %p89_p13 = scmp.ne.s32.totalorder %s156_s2, %s88_s0  ;;  %p92_p0 = scmp.lt.u32.totalorder %s88_s0, %s156_s2 }
  0x20   :  { %p94_p1 = pnand %p92_p0, %p89_p13 }
  0x22   :  { %97 = shalt.err (!%p94_p1)
}
  0x23   :  { %44 = dma.vmem_to_hbm [thread:$0]  %s39_s26, 256, %s156_s2, [#allocation6], %s103_s19, %s103_s19, %s104_s20  }
  0x24   :  { %100 = dma.done.wait [#allocation6], 256  }
  0x25   :  { %101 = vsyncadd [#allocation6], 4294967040 }
  0x26   :  { %48 = vsyncpa [#allocation5], 1 }
  0x27   :  { %49 = vsyncpa [#allocation6], 1 }

</bundles_post_ra>
